<compile_context>
chip_gen: v6e
topology: v6e:2x2x1
jax: 0.10.0
libtpu: 0.0.40
codegen_flags: <defaults>
</compile_context>

<pallas_src>
import functools

import jax
import jax.numpy as jnp
from jax.experimental import pallas as pl
from jax.experimental.pallas import tpu as pltpu


# ----------------------------------------------------------------------------
# Kernels
# ----------------------------------------------------------------------------
def _simam_kernel(x_ref, o_ref, *, inv_n, e_lambda):
    """Single-pass path: x_ref/o_ref are (row_tile, HW); one (b,c) channel/row."""
    x = x_ref[...].astype(jnp.float32)
    hw = x.shape[-1]

    mu = jnp.sum(x, axis=-1, keepdims=True) * (1.0 / hw)          # (rt, 1)
    xm = x - mu
    xm2 = xm * xm                                                 # materialized once
    s = jnp.sum(xm2, axis=-1, keepdims=True)                      # (rt, 1)

    inv_denom = 1.0 / (4.0 * (s * inv_n + e_lambda))              # per-row, exact
    y = xm2 * inv_denom + 0.5
    # sigmoid(y) == 0.5 * (tanh(y/2) + 1): transcendental on the EUP slot only.
    sig = 0.5 * (jnp.tanh(0.5 * y) + 1.0)
    o_ref[...] = (x * sig).astype(o_ref.dtype)


def _row_sum_kernel(x_ref, sum_ref, *, hw):
    """HW-blocked fallback pass 1: per-row sum(x) accumulated across HW chunks."""
    k = pl.program_id(1)

    @pl.when(k == 0)
    def _():
        sum_ref[...] = jnp.zeros_like(sum_ref)

    x = x_ref[...].astype(jnp.float32)
    ct = x.shape[-1]
    col = jax.lax.broadcasted_iota(jnp.int32, x.shape, 1) + k * ct
    x = jnp.where(col < hw, x, 0.0)                               # mask ragged HW tail
    sum_ref[...] += jnp.sum(x, axis=-1, keepdims=True)


def _row_var_kernel(x_ref, mu_ref, s_ref, *, hw):
    """HW-blocked fallback pass 2: per-row sum((x-mu)^2) across HW chunks."""
    k = pl.program_id(1)

    @pl.when(k == 0)
    def _():
        s_ref[...] = jnp.zeros_like(s_ref)

    x = x_ref[...].astype(jnp.float32)
    ct = x.shape[-1]
    xm = x - mu_ref[...]
    col = jax.lax.broadcasted_iota(jnp.int32, x.shape, 1) + k * ct
    xm = jnp.where(col < hw, xm, 0.0)                             # mask ragged HW tail
    s_ref[...] += jnp.sum(xm * xm, axis=-1, keepdims=True)


def _simam_apply_kernel(x_ref, mu_ref, invd_ref, o_ref):
    """HW-blocked fallback pass 3: elementwise apply using per-row stats."""
    x = x_ref[...].astype(jnp.float32)
    xm = x - mu_ref[...]
    y = (xm * xm) * invd_ref[...] + 0.5
    o_ref[...] = (x * (0.5 * (jnp.tanh(0.5 * y) + 1.0))).astype(o_ref.dtype)


# ----------------------------------------------------------------------------
# Wrapper
# ----------------------------------------------------------------------------
def _generation_params():
    """Returns (pipeline byte budget, vmem_limit cap, min grid steps)."""
    vmem_cap = 64 * 1024 * 1024  # conservative default (v7x-sized VMEM)
    try:
        info = pltpu.get_tpu_info()
        cap = getattr(info, "vmem_capacity_bytes", None)
        if cap:
            vmem_cap = int(cap)
    except Exception:
        pass
    if vmem_cap >= 100 * 1024 * 1024:
        # v5e / v6e: 128 MiB VMEM, single TensorCore -> big tiles, >=4 steps.
        return 48 * 1024 * 1024, 96 * 1024 * 1024, 4
    # v7x-like: 64 MiB VMEM, 2 TensorCores share the parallel axis -> >=8 steps.
    return 20 * 1024 * 1024, 48 * 1024 * 1024, 8


def simam(x, e_lambda=1e-4, *, row_tile=None, force_hw_blocking=False, hw_chunk=None):
    """SimAM forward. x: (B, C, H, W) array. Returns same shape/dtype."""
    b, c, h, w = x.shape
    hw = h * w
    rows = b * c
    # hw == 1 -> inv_n = inf, same divide-by-zero (NaN) behavior as PyTorch.
    inv_n = 1.0 / float(hw - 1) if hw > 1 else float("inf")
    e_lambda = float(e_lambda)

    x2d = x.reshape(rows, hw)
    itemsize = jnp.dtype(x.dtype).itemsize
    # Sub-32-bit dtypes pack along sublanes: align row tile to the packed count.
    align = max(8, 32 // itemsize)

    budget, limit_cap, min_steps = _generation_params()

    # Per tile-row VMEM cost: in + out double-buffered, plus ~4 f32 temps.
    bytes_per_row = hw * (4 * itemsize + 16)
    min_rt = rows if rows < align else align
    use_hw_blocking = force_hw_blocking or (min_rt * bytes_per_row > budget)

    # ---- main single-pass path: whole H*W row per block ---------------------
    if not use_hw_blocking:
        if rows < align:
            rt = rows  # block equals full first dim (satisfies tiling rule)
        else:
            rt = (budget // bytes_per_row) if row_tile is None else int(row_tile)
            # Keep at least `min_steps` grid steps (pipeline depth / both TCs).
            step_cap = max(align, (pl.cdiv(rows, min_steps) // align) * align)
            rows_cap = ((rows + align - 1) // align) * align
            rt = int(max(align, min(rt, step_cap, rows_cap)))
            rt -= rt % align

        grid = (pl.cdiv(rows, rt),)
        vmem_limit = int(min(max(2 * rt * bytes_per_row, 32 * 1024 * 1024), limit_cap))

        # Note: for tiny spatial sizes (HW < 128) stores are lane-masked; a
        # channels-on-lanes layout would be denser, but correctness is unaffected.
        kernel = functools.partial(_simam_kernel, inv_n=inv_n, e_lambda=e_lambda)
        out2d = pl.pallas_call(
            kernel,
            out_shape=jax.ShapeDtypeStruct((rows, hw), x.dtype),
            grid_spec=pltpu.PrefetchScalarGridSpec(
                num_scalar_prefetch=0,
                grid=grid,
                in_specs=[pl.BlockSpec((rt, hw), lambda i: (i, 0))],
                out_specs=pl.BlockSpec((rt, hw), lambda i: (i, 0)),
            ),
            compiler_params=pltpu.CompilerParams(
                dimension_semantics=("parallel",),
                vmem_limit_bytes=vmem_limit,
            ),
            cost_estimate=pl.CostEstimate(
                flops=10 * rows * hw,
                transcendentals=rows * hw,
                bytes_accessed=2 * rows * hw * itemsize,
            ),
        )(x2d)
        return out2d.reshape(b, c, h, w)

    # ---- large-H*W fallback: block the spatial axis too ----------------------
    rt = min_rt
    if hw_chunk is not None:
        ct = max(128, (int(hw_chunk) // 128) * 128)
    else:
        ct = (budget // (rt * (4 * itemsize + 16)) // 128) * 128
    hw_padded = ((hw + 127) // 128) * 128
    ct = int(max(128, min(ct, hw_padded)))

    nr = pl.cdiv(rows, rt)
    nc = pl.cdiv(hw, ct)
    vmem_limit = int(min(max(2 * rt * ct * (4 * itemsize + 16), 32 * 1024 * 1024),
                         limit_cap))
    stats_params = pltpu.CompilerParams(
        dimension_semantics=("parallel", "arbitrary"),
        vmem_limit_bytes=vmem_limit,
    )

    # Pass 1: per-row sum(x) -> mu. (Two-pass stats avoid catastrophic
    # cancellation of sum(x^2) - sum(x)^2/hw when |mean| >> std.)
    row_sum = pl.pallas_call(
        functools.partial(_row_sum_kernel, hw=hw),
        out_shape=jax.ShapeDtypeStruct((rows, 1), jnp.float32),
        grid_spec=pltpu.PrefetchScalarGridSpec(
            num_scalar_prefetch=0,
            grid=(nr, nc),
            in_specs=[pl.BlockSpec((rt, ct), lambda i, k: (i, k))],
            out_specs=pl.BlockSpec((rt, 1), lambda i, k: (i, 0)),
        ),
        compiler_params=stats_params,
    )(x2d)
    mu = row_sum * (1.0 / hw)                                     # (rows, 1) f32

    # Pass 2: per-row sum((x - mu)^2).
    row_s = pl.pallas_call(
        functools.partial(_row_var_kernel, hw=hw),
        out_shape=jax.ShapeDtypeStruct((rows, 1), jnp.float32),
        grid_spec=pltpu.PrefetchScalarGridSpec(
            num_scalar_prefetch=0,
            grid=(nr, nc),
            in_specs=[pl.BlockSpec((rt, ct), lambda i, k: (i, k)),
                      pl.BlockSpec((rt, 1), lambda i, k: (i, 0))],
            out_specs=pl.BlockSpec((rt, 1), lambda i, k: (i, 0)),
        ),
        compiler_params=stats_params,
    )(x2d, mu)
    inv_denom = 1.0 / (4.0 * (row_s * inv_n + e_lambda))          # (rows, 1) f32

    # Pass 3: elementwise apply.
    out2d = pl.pallas_call(
        _simam_apply_kernel,
        out_shape=jax.ShapeDtypeStruct((rows, hw), x.dtype),
        grid_spec=pltpu.PrefetchScalarGridSpec(
            num_scalar_prefetch=0,
            grid=(nr, nc),
            in_specs=[pl.BlockSpec((rt, ct), lambda i, k: (i, k)),
                      pl.BlockSpec((rt, 1), lambda i, k: (i, 0)),
                      pl.BlockSpec((rt, 1), lambda i, k: (i, 0))],
            out_specs=pl.BlockSpec((rt, ct), lambda i, k: (i, k)),
        ),
        compiler_params=pltpu.CompilerParams(
            dimension_semantics=("parallel", "parallel"),
            vmem_limit_bytes=vmem_limit,
        ),
        cost_estimate=pl.CostEstimate(
            flops=8 * rows * hw,
            transcendentals=rows * hw,
            bytes_accessed=2 * rows * hw * itemsize,
        ),
    )(x2d, mu, inv_denom)
    return out2d.reshape(b, c, h, w)


def simam_reference(x, e_lambda=1e-4):
    """Plain-JAX reference matching the PyTorch forward exactly."""
    b, c, h, w = x.shape
    n = w * h - 1
    mu = jnp.mean(x, axis=(2, 3), keepdims=True)
    xmm2 = (x - mu) ** 2
    y = xmm2 / (4.0 * (jnp.sum(xmm2, axis=(2, 3), keepdims=True) / n + e_lambda)) + 0.5
    return x * jax.nn.sigmoid(y)


if __name__ == "__main__":
    key = jax.random.PRNGKey(0)

    # Case 1: canonical small NCHW input (single-pass path).
    x = jax.random.normal(key, (2, 4, 16, 16), dtype=jnp.float32)
    out = jax.block_until_ready(simam(x, e_lambda=1e-4))
    ref = simam_reference(x, e_lambda=1e-4)
    assert out.shape == x.shape and out.dtype == x.dtype
    assert jnp.allclose(out, ref, atol=1e-5, rtol=1e-5), "mismatch vs reference (case 1)"

    # Case 2: ragged rows (B*C=15 not a multiple of the row tile), small HW.
    x2 = jax.random.normal(jax.random.PRNGKey(1), (3, 5, 8, 8), dtype=jnp.float32)
    out2 = jax.block_until_ready(simam(x2, e_lambda=1e-4))
    ref2 = simam_reference(x2, e_lambda=1e-4)
    assert out2.shape == x2.shape and out2.dtype == x2.dtype
    assert jnp.allclose(out2, ref2, atol=1e-5, rtol=1e-5), "mismatch vs reference (case 2)"

    # Case 3: force the large-H*W spatially-blocked fallback (ragged HW tail,
    # masked lane reductions) at a small shape so it is exercised in CI.
    x3 = jax.random.normal(jax.random.PRNGKey(2), (2, 3, 16, 20), dtype=jnp.float32)
    out3 = jax.block_until_ready(simam(x3, e_lambda=1e-4,
                                       force_hw_blocking=True, hw_chunk=128))
    ref3 = simam_reference(x3, e_lambda=1e-4)
    assert out3.shape == x3.shape and out3.dtype == x3.dtype
    assert jnp.allclose(out3, ref3, atol=1e-5, rtol=1e-5), "mismatch vs reference (case 3)"

    print("KERNEL_OK")
</pallas_src>

<mosaic_0001>
module attributes {stable_mosaic.version = 11 : i64} {
  func.func @_simam_kernel(%arg0: i32, %arg1: memref<8x256xf32, #tpu.memory_space<vmem>>, %arg2: memref<8x256xf32, #tpu.memory_space<vmem>>) attributes {dimension_semantics = [#tpu.dimension_semantics<parallel>], iteration_bounds = array<i64: 1>, scalar_prefetch = 0 : i64, scratch_operands = 0 : i64, tpu.core_type = #tpu.core_type<tc>, window_params = [{transform_indices = @transform_0, window_bounds = array<i64: 8, 256>}, {transform_indices = @transform_1, window_bounds = array<i64: 8, 256>}]} {
    %c0 = arith.constant 0 : index
    %c0_0 = arith.constant 0 : index
    %0 = vector.load %arg1[%c0, %c0_0] : memref<8x256xf32, #tpu.memory_space<vmem>>, vector<8x256xf32>
    %cst = arith.constant dense<0.000000e+00> : vector<8xf32>
    %1 = vector.multi_reduction <add>, %0, %cst [1] : vector<8x256xf32> to vector<8xf32>
    %2 = vector.shape_cast %1 : vector<8xf32> to vector<8x1xf32>
    %cst_1 = arith.constant 3.906250e-03 : f32
    %3 = vector.broadcast %cst_1 : f32 to vector<8x1xf32>
    %4 = arith.mulf %2, %3 : vector<8x1xf32>
    %5 = vector.broadcast %4 : vector<8x1xf32> to vector<8x256xf32>
    %6 = arith.subf %0, %5 : vector<8x256xf32>
    %7 = arith.mulf %6, %6 : vector<8x256xf32>
    %cst_2 = arith.constant dense<0.000000e+00> : vector<8xf32>
    %8 = vector.multi_reduction <add>, %7, %cst_2 [1] : vector<8x256xf32> to vector<8xf32>
    %9 = vector.shape_cast %8 : vector<8xf32> to vector<8x1xf32>
    %cst_3 = arith.constant 0.00392156886 : f32
    %10 = vector.broadcast %cst_3 : f32 to vector<8x1xf32>
    %11 = arith.mulf %9, %10 : vector<8x1xf32>
    %cst_4 = arith.constant 9.99999974E-5 : f32
    %12 = vector.broadcast %cst_4 : f32 to vector<8x1xf32>
    %13 = arith.addf %11, %12 : vector<8x1xf32>
    %cst_5 = arith.constant 4.000000e+00 : f32
    %14 = vector.broadcast %cst_5 : f32 to vector<8x1xf32>
    %15 = arith.mulf %14, %13 : vector<8x1xf32>
    %cst_6 = arith.constant 1.000000e+00 : f32
    %16 = vector.broadcast %cst_6 : f32 to vector<8x1xf32>
    %17 = arith.divf %16, %15 : vector<8x1xf32>
    %18 = vector.broadcast %17 : vector<8x1xf32> to vector<8x256xf32>
    %19 = arith.mulf %7, %18 : vector<8x256xf32>
    %cst_7 = arith.constant 5.000000e-01 : f32
    %20 = vector.broadcast %cst_7 : f32 to vector<8x256xf32>
    %21 = arith.addf %19, %20 : vector<8x256xf32>
    %cst_8 = arith.constant 5.000000e-01 : f32
    %22 = vector.broadcast %cst_8 : f32 to vector<8x256xf32>
    %23 = arith.mulf %22, %21 : vector<8x256xf32>
    %24 = math.tanh %23 : vector<8x256xf32>
    %cst_9 = arith.constant 1.000000e+00 : f32
    %25 = vector.broadcast %cst_9 : f32 to vector<8x256xf32>
    %26 = arith.addf %24, %25 : vector<8x256xf32>
    %cst_10 = arith.constant 5.000000e-01 : f32
    %27 = vector.broadcast %cst_10 : f32 to vector<8x256xf32>
    %28 = arith.mulf %27, %26 : vector<8x256xf32>
    %29 = arith.mulf %0, %28 : vector<8x256xf32>
    %c0_11 = arith.constant 0 : index
    %c0_12 = arith.constant 0 : index
    %30 = vector.load %arg2[%c0_11, %c0_12] : memref<8x256xf32, #tpu.memory_space<vmem>>, vector<8x256xf32>
    tpu.vector_store %arg2[%c0_11, %c0_12], %29 {strides = array<i32>} : memref<8x256xf32, #tpu.memory_space<vmem>>, vector<8x256xf32>,
    return
  }
  func.func @transform_0(%arg0: i32) -> (i32, i32) {
    %c0_i32 = arith.constant 0 : i32
    %c0_i32_0 = arith.constant 0 : i32
    return %arg0, %c0_i32 : i32, i32
  }
  func.func @transform_1(%arg0: i32) -> (i32, i32) {
    %c0_i32 = arith.constant 0 : i32
    %c0_i32_0 = arith.constant 0 : i32
    return %arg0, %c0_i32 : i32, i32
  }
}

</mosaic_0001>

<bundles_post_ra>
// kernel: tpu_custom_call.1
= control target key start
LH: loop header
LB: loop body
LE: loop exit
PB: predicated region body
PF: predicated region fallthrough
CT: control target
= control target key end

     0   :  { %6 = vsyncpa [#allocation3], 0  ;;  %s140_s0 = inlined_call_operand.hbm [shape: f32[8,256], index: 0, kind: input, shape index: {}]   ;;  %s141_s1 = inlined_call_operand.hbm [shape: f32[8,256], index: 1, kind: output, shape index: {}]  }
   0x1   :  { %7 = vsyncpa [#allocation4], 0  ;;  %s122_s6 = smov [#allocation2]  }
   0x2   :  { %s14_s7 = sshll.u32 %s122_s6, 4  ;;  %s15_s7 = int_to_ptr.vmem [resolvable:$true] %s14_s7 }
   0x3   :  { %s86_s8 = scalar_lea.vmem %s15_s7, 256  ;;  %p91_p1 = scmp.lt.s32.totalorder %s15_s7, %s15_s7 }
   0x4   :  { %p87_p0 = scmp.ne.s32.totalorder %s15_s7, %s86_s8  ;;  %p92_p2 = scmp.lt.s32.totalorder %s86_s8, %s86_s8 }
   0x6   :  { %p93_p3 = por %p92_p2, %p91_p1 }
   0x8   :  { %p94_p4 = pnand %p93_p3, %p87_p0 }
   0xa   :  { %97 = shalt.err (!%p94_p4)
}
   0xb   :  { %17 = dma.hbm_to_vmem [thread:$0]  %s140_s0, 256, %s15_s7, [#allocation3]  }
   0xc   :  { %118 = dma.done.wait [#allocation3], 256  }
   0xd   :  { %119 = vsyncadd [#allocation3], 4294967040  ;;  %v21_v0 = vld [vmem:[#allocation2] sm:$0xff]  ;;  %v22_v1 = vld [vmem:[#allocation2 + $0x8] sm:$0xff]  ;;  %s123_s0 = smov [#allocation5]  }
   0xe   :  { %v23_v2 = vadd.f32 %v22_v1, %v21_v0  ;;  %s61_s11 = sshll.u32 %s123_s0, 4  ;;  %s62_s11 = int_to_ptr.vmem [resolvable:$true] %s61_s11 }
   0xf   :  { %s98_s12 = scalar_lea.vmem %s62_s11, 256  ;;  %p103_p6 = scmp.lt.s32.totalorder %s62_s11, %s62_s11 }
  0x10   :  { %24 = vadd.xlane.f32.xlu0 %v23_v2  ;;  %p99_p5 = scmp.ne.s32.totalorder %s62_s11, %s98_s12  ;;  %p104_p7 = scmp.lt.s32.totalorder %s98_s12, %s98_s12 }
  0x12   :  { %p105_p8 = por %p104_p7, %p103_p6 }
  0x14   :  { %p106_p9 = pnand %p105_p8, %p99_p5 }
  0x99   :  { %v25_v3 = vpop.xlane.xlu0 %24 }
  0x9a   :  { %v26_v4 = vmul.f32 0.00390625, %v25_v3 }
  0x9c   :  { %v27_v5 = vsub.f32 %v21_v0, %v26_v4  ;;  %v28_v6 = vsub.f32 %v22_v1, %v26_v4 }
  0x9e   :  { %v29_v7 = vmul.f32 %v27_v5, %v27_v5  ;;  %v30_v8 = vmul.f32 %v28_v6, %v28_v6 }
  0xa0   :  { %v31_v9 = vadd.f32 %v30_v8, %v29_v7 }
  0xa2   :  { %32 = vadd.xlane.f32.xlu0 %v31_v9 }
 0x12b   :  { %v33_v10 = vpop.xlane.xlu0 %32 }
 0x12c   :  { %v34_v11 = vmul.f32 0.003921569, %v33_v10 }
 0x12e   :  { %v35_v12 = vadd.f32 0.0001, %v34_v11 }
 0x130   :  { %v36_v13 = vmul.f32 4.0, %v35_v12 }
 0x132   :  { %72 = vrcp.f32 %v36_v13 }
 0x13f   :  { %v73_v14 = vpop.eup %72 }
 0x140   :  { %v39_v15 = vmul.f32 %v73_v14, %v29_v7  ;;  %v40_v16 = vmul.f32 %v73_v14, %v30_v8 }
 0x142   :  { %v41_v17 = vadd.f32 0.5, %v39_v15  ;;  %v42_v18 = vadd.f32 0.5, %v40_v16 }
 0x144   :  { %v43_v19 = vmul.f32 0.5, %v41_v17  ;;  %v44_v20 = vmul.f32 0.5, %v42_v18 }
 0x146   :  { %74 = vtanh.f32 %v43_v19 }
 0x147   :  { %76 = vtanh.f32 %v44_v20 }
 0x153   :  { %v75_v21 = vpop.eup %74 }
 0x154   :  { %v77_v22 = vpop.eup %76  ;;  %v47_v23 = vadd.f32 1.0, %v75_v21 }
 0x155   :  { %v48_v24 = vadd.f32 1.0, %v77_v22 }
 0x156   :  { %v49_v25 = vmul.f32 0.5, %v47_v23 }
 0x157   :  { %v50_v26 = vmul.f32 0.5, %v48_v24 }
 0x158   :  { %v51_v27 = vmul.f32 %v49_v25, %v21_v0 }
 0x159   :  { %v52_v28 = vmul.f32 %v50_v26, %v22_v1 }
 0x15a   :  { %53 = vst [vmem:[#allocation5] sm:$0xff] %v51_v27 }
 0x15b   :  { %54 = vst [vmem:[#allocation5 + $0x8] sm:$0xff] %v52_v28 }
 0x15c   :  { %109 = shalt.err (!%p106_p9)
}
 0x15d   :  { %64 = dma.vmem_to_hbm [thread:$0]  %s62_s11, 256, %s141_s1, [#allocation4]  }
 0x15e   :  { %120 = dma.done.wait [#allocation4], 256  }
 0x15f   :  { %121 = vsyncadd [#allocation4], 4294967040 }
 0x160   :  { %68 = vsyncpa [#allocation3], 1 }
 0x161   :  { %69 = vsyncpa [#allocation4], 1 }

</bundles_post_ra>
